<compile_context>
chip_gen: v7x
topology: tpu7x:2x2x1
jax: 0.10.0
libtpu: 0.0.40
codegen_flags: <defaults>
</compile_context>

<pallas_src>
import jax
import jax.numpy as jnp
from jax.experimental import pallas as pl
from jax.experimental.pallas import tpu as pltpu


# -----------------------------------------------------------------------------
# Pallas kernel: one grid step == one graph in the batch.
# Fuses  y = (adj @ x) @ W  entirely in VMEM.
# -----------------------------------------------------------------------------
def _graph_conv_kernel(adj_ref, x_ref, w_ref, out_ref):
    adj = adj_ref[0]                                   # (N, N)
    x = x_ref[0]                                       # (N, F)
    w = w_ref[...]                                     # (F, O)

    # Neighbor aggregation on the MXU, f32 accumulation.
    agg = jnp.dot(adj, x, preferred_element_type=jnp.float32)      # (N, F)
    # Feature projection on the MXU, f32 accumulation.
    y = jnp.dot(agg, w, preferred_element_type=jnp.float32)        # (N, O)

    out_ref[0] = y.astype(out_ref.dtype)


# -----------------------------------------------------------------------------
# Wrapper
# -----------------------------------------------------------------------------
def graph_conv(x, adj, weight):
    """GraphConv forward.

    x:      (B, N, input_dim)  or (N, input_dim)
    adj:    (B, N, N)          or (N, N)
    weight: (input_dim, output_dim)
    returns (B, N, output_dim) or (N, output_dim)
    """
    squeeze = False
    if x.ndim == 2:                                    # unbatched, like torch.matmul broadcasting
        x = x[None]
        adj = adj[None]
        squeeze = True

    B, N, F = x.shape
    Fw, O = weight.shape
    assert F == Fw, "feature dim mismatch"
    assert adj.shape == (B, N, N), "adjacency shape mismatch"

    out = pl.pallas_call(
        _graph_conv_kernel,
        out_shape=jax.ShapeDtypeStruct((B, N, O), x.dtype),
        grid_spec=pltpu.PrefetchScalarGridSpec(
            num_scalar_prefetch=0,
            grid=(B,),
            in_specs=[
                pl.BlockSpec((1, N, N), lambda b: (b, 0, 0)),   # adj[b]
                pl.BlockSpec((1, N, F), lambda b: (b, 0, 0)),   # x[b]
                pl.BlockSpec((F, O), lambda b: (0, 0)),         # weight (VMEM-resident)
            ],
            out_specs=pl.BlockSpec((1, N, O), lambda b: (b, 0, 0)),
        ),
        compiler_params=pltpu.CompilerParams(
            dimension_semantics=("parallel",)),                 # graphs are independent
    )(adj, x, weight)

    return out[0] if squeeze else out


# -----------------------------------------------------------------------------
# Pure-JAX reference for verification
# -----------------------------------------------------------------------------
def reference_forward(x, adj, weight):
    return jnp.matmul(jnp.matmul(adj, x), weight)


if __name__ == "__main__":
    # Small shapes consistent with the module: batch of 2 graphs, 16 nodes,
    # input_dim=32, output_dim=128 (lane-dense output width).
    B, N, input_dim, output_dim = 2, 16, 32, 128

    key = jax.random.PRNGKey(0)
    kx, ka, kw = jax.random.split(key, 3)

    x = jax.random.normal(kx, (B, N, input_dim), jnp.float32)
    # Random dense adjacency (0/1) with self-loops.
    adj = (jax.random.uniform(ka, (B, N, N), jnp.float32) < 0.3).astype(jnp.float32)
    adj = jnp.maximum(adj, jnp.eye(N, dtype=jnp.float32)[None])
    # The torch module leaves `weight` uninitialized; use a deterministic
    # random init here so the check is meaningful.
    weight = 0.1 * jax.random.normal(kw, (input_dim, output_dim), jnp.float32)

    out = graph_conv(x, adj, weight)
    out = jax.block_until_ready(out)

    ref = reference_forward(x, adj, weight)
    assert out.shape == (B, N, output_dim)
    assert jnp.allclose(out, ref, atol=1e-4, rtol=1e-4), "mismatch vs reference"

    print("KERNEL_OK")
</pallas_src>

<mosaic_0001>
module attributes {stable_mosaic.version = 11 : i64} {
  func.func @_graph_conv_kernel(%arg0: i32, %arg1: memref<1x16x16xf32, #tpu.memory_space<vmem>>, %arg2: memref<1x16x32xf32, #tpu.memory_space<vmem>>, %arg3: memref<32x128xf32, #tpu.memory_space<vmem>>, %arg4: memref<1x16x128xf32, #tpu.memory_space<vmem>>) attributes {dimension_semantics = [#tpu.dimension_semantics<parallel>], iteration_bounds = array<i64: 2>, scalar_prefetch = 0 : i64, scratch_operands = 0 : i64, tpu.core_type = #tpu.core_type<tc>, window_params = [{transform_indices = @transform_0, window_bounds = array<i64: 1, 16, 16>}, {transform_indices = @transform_1, window_bounds = array<i64: 1, 16, 32>}, {pipeline_mode = #tpu.pipeline_mode<synchronous>, transform_indices = @transform_2, window_bounds = array<i64: 32, 128>}, {transform_indices = @transform_3, window_bounds = array<i64: 1, 16, 128>}]} {
    %c0 = arith.constant 0 : index
    %c0_0 = arith.constant 0 : index
    %c0_1 = arith.constant 0 : index
    %0 = vector.load %arg1[%c0, %c0_0, %c0_1] : memref<1x16x16xf32, #tpu.memory_space<vmem>>, vector<1x16x16xf32>
    %1 = vector.shape_cast %0 : vector<1x16x16xf32> to vector<16x16xf32>
    %c0_2 = arith.constant 0 : index
    %c0_3 = arith.constant 0 : index
    %c0_4 = arith.constant 0 : index
    %2 = vector.load %arg2[%c0_2, %c0_3, %c0_4] : memref<1x16x32xf32, #tpu.memory_space<vmem>>, vector<1x16x32xf32>
    %3 = vector.shape_cast %2 : vector<1x16x32xf32> to vector<16x32xf32>
    %c0_5 = arith.constant 0 : index
    %c0_6 = arith.constant 0 : index
    %4 = vector.load %arg3[%c0_5, %c0_6] : memref<32x128xf32, #tpu.memory_space<vmem>>, vector<32x128xf32>
    %cst = arith.constant dense<0.000000e+00> : vector<16x32xf32>
    %5 = tpu.matmul %1, %3, %cst {dimension_numbers = #tpu.dot_dimension_numbers<[1], [0], [0], [1], [0, 0, 1, 1], [], []>} : vector<16x16xf32>, vector<16x32xf32>, vector<16x32xf32> -> vector<16x32xf32>
    %cst_7 = arith.constant dense<0.000000e+00> : vector<16x128xf32>
    %6 = tpu.matmul %5, %4, %cst_7 {dimension_numbers = #tpu.dot_dimension_numbers<[1], [0], [0], [1], [0, 0, 1, 1], [], []>} : vector<16x32xf32>, vector<32x128xf32>, vector<16x128xf32> -> vector<16x128xf32>
    %c0_8 = arith.constant 0 : index
    %c0_9 = arith.constant 0 : index
    %c0_10 = arith.constant 0 : index
    %7 = vector.load %arg4[%c0_8, %c0_9, %c0_10] : memref<1x16x128xf32, #tpu.memory_space<vmem>>, vector<1x16x128xf32>
    %8 = vector.shape_cast %7 : vector<1x16x128xf32> to vector<16x128xf32>
    %9 = vector.shape_cast %6 : vector<16x128xf32> to vector<1x16x128xf32>
    tpu.vector_store %arg4[%c0_8, %c0_9, %c0_10], %9 {strides = array<i32>} : memref<1x16x128xf32, #tpu.memory_space<vmem>>, vector<1x16x128xf32>,
    return
  }
  func.func @transform_0(%arg0: i32) -> (i32, i32, i32) {
    %c0_i32 = arith.constant 0 : i32
    %c0_i32_0 = arith.constant 0 : i32
    %c0_i32_1 = arith.constant 0 : i32
    return %arg0, %c0_i32, %c0_i32_0 : i32, i32, i32
  }
  func.func @transform_1(%arg0: i32) -> (i32, i32, i32) {
    %c0_i32 = arith.constant 0 : i32
    %c0_i32_0 = arith.constant 0 : i32
    %c0_i32_1 = arith.constant 0 : i32
    return %arg0, %c0_i32, %c0_i32_0 : i32, i32, i32
  }
  func.func @transform_2(%arg0: i32) -> (i32, i32) {
    %c0_i32 = arith.constant 0 : i32
    %c0_i32_0 = arith.constant 0 : i32
    %c0_i32_1 = arith.constant 0 : i32
    return %c0_i32, %c0_i32_0 : i32, i32
  }
  func.func @transform_3(%arg0: i32) -> (i32, i32, i32) {
    %c0_i32 = arith.constant 0 : i32
    %c0_i32_0 = arith.constant 0 : i32
    %c0_i32_1 = arith.constant 0 : i32
    return %arg0, %c0_i32, %c0_i32_0 : i32, i32, i32
  }
}

</mosaic_0001>

<bundles_post_ra>
// kernel: tpu_custom_call.1
= control target key start
LH: loop header
LB: loop body
LE: loop exit
PB: predicated region body
PF: predicated region fallthrough
CT: control target
= control target key end

     0   :  { %s1121_s0 = inlined_call_operand.hbm [shape: f32[2,16,16], index: 0, kind: input, shape index: {}]   ;;  %s1122_s1 = inlined_call_operand.hbm [shape: f32[2,16,32], index: 1, kind: input, shape index: {}]   ;;  %s1123_s2 = inlined_call_operand.hbm [shape: f32[32,128], index: 2, kind: input, shape index: {}]   ;;  %s1124_s3 = inlined_call_operand.hbm [shape: f32[2,16,128], index: 3, kind: output, shape index: {}]  }
   0x1   :  { %1132 = sst [smem:[#allocation13_spill]] %s1121_s0 }
   0x2   :  { %1133 = sst [smem:[#allocation14_spill]] %s1123_s2 }
   0x3   :  { %8 = vsyncpa [#allocation3], 0 }
   0x4   :  { %10 = vsyncpa [#allocation3 + $0x1], 0 }
   0x5   :  { %11 = vsyncpa [#allocation6], 0 }
   0x6   :  { %13 = vsyncpa [#allocation6 + $0x1], 0 }
   0x7   :  { %14 = vsyncpa [#allocation4], 0 }
   0x8   :  { %16 = vsyncpa [#allocation4 + $0x1], 0  ;;  %s861_s12 = smov 0   ;;  %s863_s13 = smov 0  }
   0x9   :  { %s865_s14 = smov 0   ;;  %s867_s15 = smov 0  }
   0xa LB: > { %s882_s16 = sadd.s32 4294967295, %s831_s15   ;;  %s536_s17 = sadd.s32 4294967294, %s831_s15   ;;  %s831_s15 = sphi %s867_s15, %s1154_s15   ;;  %s827_s14 = sphi %s865_s14, %s1153_s14   ;;  %s823_s13 = sphi %s863_s13, %s1152_s13   ;;  %s819_s12 = sphi %s861_s12, %s1151_s12  }
   0xb   : > { %p42_p0 = scmp.ne.s32.totalorder %s823_s13, %s819_s12  ;;  %p1125_p1 = scmp.eq.s32.totalorder %s882_s16, 0 }
   0xc   : > { %p119_p3 = scmp.eq.s32.totalorder %s536_s17, 1  ;;  %p537_p5 = scmp.ge.s32.totalorder %s831_s15, 1 }
   0xd   : > { %p891_p4 = por %p1125_p1, %p42_p0  ;;  %p126_p7 = scmp.lt.s32.totalorder %s831_s15, 3 }
   0xe   : > { %p896_p6 = por %p119_p3, %p42_p0  ;;  %s833_s21 = smov [#allocation7]  }
   0xf   : > { %s1134_s18 = scalar_select %p891_p4, 1, 0 }
  0x10   : > { %s1135_s19 = scalar_select %p896_p6, 1, 0 }
  0x11   : > { %p901_p8 = pnand %p537_p5, %p126_p7  ;;  %s138_s22 = sshll.u32 %s833_s21, 4  ;;  %s905_s22 = int_to_ptr.vmem [resolvable:$true] %s138_s22 }
  0x12   : > { %s917_s24 = sadd.s32 1, %s831_s15   ;;  %s29_s25 = sadd.s32 1, %s827_s14 }
  0x13   : > { %s1136_s20 = scalar_select %p901_p8, 1, 0 }
  0x14   : > { %p613_p9 = pneg %p901_p8  ;;  %s26_s26 = ssub.s32 %s831_s15, %s917_s24 }
  0x15   : > { %s1138_s2 = sld [smem:[#allocation14_spill]] }
  0x16   : > { %p912_p11 = pnand %p613_p9, %p1125_p1 }
  0x18   : > { %p671_p13 = pneg %p912_p11 }
  0x1b   : > { %s669_s29 = scalar_lea.hbm %s1138_s2, 512 }
  0x1c   : > { %p670_p12 = scmp.ne.s32.totalorder %s1138_s2, %s669_s29  ;;  %p676_p5 = scmp.lt.u32.totalorder %s669_s29, %s1138_s2 }
  0x1e   : > { %p672_p0 = pnand %p671_p13, %p670_p12 }
  0x20   : > { %p673_p3 = pneg %p672_p0 }
  0x22   : > { %p678_p7 = pnand %p676_p5, %p673_p3 }
  0x24   : > { %681 = shalt.err (!%p678_p7)
}
  0x25   : > { %s682_s7 = scalar_lea.vmem %s905_s22, 512  ;;  %p690_p2 = scmp.lt.s32.totalorder %s905_s22, %s905_s22 }
  0x26   : > { %p683_p9 = scmp.ne.s32.totalorder %s905_s22, %s682_s7  ;;  %p691_p6 = scmp.lt.s32.totalorder %s682_s7, %s682_s7 }
  0x28   : > { %p685_p10 = pnand %p683_p9, %p671_p13  ;;  %p692_p4 = por %p691_p6, %p690_p2 }
  0x2a   : > { %p686_p1 = pneg %p685_p10 }
  0x2c   : > { %p693_p8 = pnand %p692_p4, %p686_p1 }
  0x2e   : > { %696 = shalt.err (!%p693_p8)
}
  0x2f   : > { %s1128_s8 = smov 128   ;;  %s1130_s9 = smov 8  }
  0x30   : > { %616 = dma.hbm_to_vmem [thread:$0]  (!%p912_p11), %s1138_s2, 512, %s905_s22, [#allocation6], %s1128_s8, %s1128_s8, %s1130_s9  }
  0x31   : > { %p27_p1 = scmp.eq.s32.totalorder %s26_s26, 0  ;;  %p36_p2 = scmp.ne.s32.totalorder %s827_s14, %s823_s13 }
  0x32   : > { %p37_p4 = scmp.eq.s32.totalorder %s831_s15, 0  ;;  %p629_p6 = scmp.lt.s32.totalorder %s831_s15, 2 }
  0x33   : > { %s951_s17 = scalar_select %p27_p1, %s827_s14, %s29_s25  }
  0x34   : > { %p38_p8 = por %p37_p4, %p36_p2  ;;  %p1139_p10 = scmp.eq.s32.totalorder %s882_s16, 1 }
  0x35   : > { %s152_s23 = sand.u32 1, %s827_s14   ;;  %s560_s27 = sshll.u32 %s831_s15, 8 }
  0x36   : > { %p955_p12 = por %p1139_p10, %p36_p2  ;;  %s961_s28 = sshll.u32 %s152_s23, 4 }
  0x37   : > { %s1141_s0 = sld [smem:[#allocation13_spill]]  ;;  %s156_s25 = scalar_lea.vmem [#allocation2], %s961_s28 }
  0x38   : > { %s163_s26 = sshll.u32 %s156_s25, 4  ;;  %p969_p11 = pnand %p629_p6, %p38_p8  ;;  %s973_s26 = int_to_ptr.vmem [resolvable:$true] %s163_s26 }
  0x39   : > { %s978_s7 = scalar_lea.hbm %s1122_s1, %s560_s27  ;;  %s980_s10 = scalar_lea.sflag [#allocation3], %s152_s23 }
  0x3a   : > { %p699_p0 = pneg %p969_p11 }
  0x3d   : > { %s966_s22 = scalar_lea.hbm %s1141_s0, %s560_s27  ;;  %s702_s25 = scalar_lea.hbm %s1141_s0, 512 }
  0x3e   : > { %s697_s11 = scalar_lea.hbm %s966_s22, 256  ;;  %p703_p7 = scmp.lt.u32.totalorder %s966_s22, %s1141_s0 }
  0x3f   : > { %p698_p13 = scmp.ne.s32.totalorder %s966_s22, %s697_s11  ;;  %p704_p9 = scmp.lt.u32.totalorder %s702_s25, %s697_s11 }
  0x40   : > { %p706_p2 = scmp.lt.u32.totalorder %s697_s11, %s966_s22 }
  0x41   : > { %p700_p3 = pnand %p699_p0, %p698_p13  ;;  %p705_p1 = por %p704_p9, %p703_p7 }
  0x43   : > { %p701_p5 = pneg %p700_p3  ;;  %p707_p4 = por %p706_p2, %p705_p1 }
  0x45   : > { %p708_p6 = pnand %p707_p4, %p701_p5 }
  0x47   : > { %711 = shalt.err (!%p708_p6)
}
  0x48   : > { %s712_s23 = scalar_lea.vmem %s973_s26, 256  ;;  %s836_s27 = smov [#allocation2]  }
  0x49   : > { %p713_p8 = scmp.ne.s32.totalorder %s973_s26, %s712_s23  ;;  %s717_s5 = sshll.u32 %s836_s27, 4  ;;  %s718_s5 = int_to_ptr.vmem [resolvable:$false] %s717_s5 }
  0x4a   : > { %s719_s8 = scalar_lea.vmem %s718_s5, 512  ;;  %p720_p3 = scmp.lt.s32.totalorder %s973_s26, %s718_s5 }
  0x4b   : > { %p715_p10 = pnand %p713_p8, %p699_p0  ;;  %p721_p7 = scmp.lt.s32.totalorder %s719_s8, %s712_s23 }
  0x4d   : > { %p716_p13 = pneg %p715_p10  ;;  %p722_p9 = por %p721_p7, %p720_p3 }
  0x4f   : > { %p723_p1 = pnand %p722_p9, %p716_p13 }
  0x51   : > { %726 = shalt.err (!%p723_p1)
}
  0x52   : > { %s1143_s9 = smov 8   ;;  %s1144_s6 = smov 128  }
  0x53   : > { %620 = dma.hbm_to_vmem [thread:$0]  (!%p969_p11), %s966_s22, 256, %s973_s26, %s980_s10, %s1144_s6, %s1144_s6, %s1143_s9  }
  0x54   : > { %s177_s11 = scalar_lea.vmem [#allocation5], %s961_s28  ;;  %s173_s30 = sand.u32 1, %s831_s15  }
  0x55   : > { %s184_s29 = sshll.u32 %s177_s11, 4  ;;  %s1015_s25 = scalar_lea.sflag [#allocation6], %s173_s30  ;;  %s1013_s29 = int_to_ptr.vmem [resolvable:$true] %s184_s29 }
  0x56   : > { %s727_s23 = scalar_lea.hbm %s978_s7, 256  ;;  %s732_s8 = scalar_lea.hbm %s1122_s1, 512 }
  0x57   : > { %p728_p5 = scmp.ne.s32.totalorder %s978_s7, %s727_s23  ;;  %p733_p6 = scmp.lt.u32.totalorder %s978_s7, %s1122_s1 }
  0x58   : > { %p734_p8 = scmp.lt.u32.totalorder %s732_s8, %s727_s23  ;;  %p736_p13 = scmp.lt.u32.totalorder %s727_s23, %s978_s7 }
  0x59   : > { %p730_p2 = pnand %p728_p5, %p699_p0 }
  0x5a   : > { %p735_p10 = por %p734_p8, %p733_p6 }
  0x5b   : > { %p731_p4 = pneg %p730_p2 }
  0x5c   : > { %p737_p3 = por %p736_p13, %p735_p10 }
  0x5e   : > { %p738_p7 = pnand %p737_p3, %p731_p4 }
  0x60   : > { %741 = shalt.err (!%p738_p7)
}
  0x61   : > { %s742_s28 = scalar_lea.vmem %s1013_s29, 256  ;;  %s837_s22 = smov [#allocation5]  }
  0x62   : > { %p743_p9 = scmp.ne.s32.totalorder %s1013_s29, %s742_s28  ;;  %s747_s26 = sshll.u32 %s837_s22, 4  ;;  %s748_s26 = int_to_ptr.vmem [resolvable:$false] %s747_s26 }
  0x63   : > { %s749_s0 = scalar_lea.vmem %s748_s26, 512  ;;  %p750_p2 = scmp.lt.s32.totalorder %s1013_s29, %s748_s26 }
  0x64   : > { %p745_p1 = pnand %p743_p9, %p699_p0  ;;  %p751_p6 = scmp.lt.s32.totalorder %s749_s0, %s742_s28 }
  0x66   : > { %p746_p5 = pneg %p745_p1  ;;  %p752_p8 = por %p751_p6, %p750_p2 }
  0x68   : > { %p753_p10 = pnand %p752_p8, %p746_p5 }
  0x6a   : > { %756 = shalt.err (!%p753_p10)
}
  0x6b   : > { %623 = dma.hbm_to_vmem [thread:$0]  (!%p969_p11), %s978_s7, 256, %s1013_s29, %s1015_s25, %s1144_s6, %s1144_s6, %s1143_s9  }
  0x6c   : > { %p1145_p0 = scmp.ne.s32.totalorder %s1136_s20, 0 }
  0x6d   : > { %s1047_s2 = sand.u32 (!%p1145_p0), 1, %s823_s13   ;;  %p1146_p4 = scmp.ne.s32.totalorder (!%p1145_p0), %s1134_s18, 0 }
  0x6e   : > { %196 = sbr.rel (%p1145_p0) target bundleno = 573 (0x23d), region = 32  ;;  %s1050_s10 = sshll.u32 (!%p1145_p0), %s1047_s2, 4 }
  0x6f   : > { %s199_s4 = scalar_lea.sflag (!%p1145_p0), [#allocation3], %s1047_s2  ;;  %s202_s11 = scalar_lea.vmem (!%p1145_p0), [#allocation2], %s1050_s10 }
  0x75   : > { %802 = dma.done.wait (%p1146_p4), %s199_s4, 256  }
  0x76   : > { %804 = vsyncadd (%p1146_p4), %s199_s4, 4294967040  ;;  %s207_s20 = sand.u32 1, %s882_s16   ;;  %s211_s9 = scalar_lea.vmem [#allocation5], %s1050_s10 }
  0x77   : > { %s208_s7 = scalar_lea.sflag [#allocation6], %s207_s20 }
  0x78   : > { %806 = dma.done.wait (%p1146_p4), %s208_s7, 256  }
  0x79   : > { %808 = vsyncadd (%p1146_p4), %s208_s7, 4294967040  ;;  %p1147_p11 = scmp.eq.s32.totalorder %s882_s16, 0 }
  0x7b   : > { %810 = dma.done.wait (%p1147_p11), [#allocation6], 512   ;;  %p1148_p13 = pmov %p1147_p11 }
  0x7c   : > { %vm251_vm0 = vcmask 130048   ;;  %v245_v0 = vld [vmem:[%s211_s9] sm:$0xff]  ;;  %v246_v1 = vld [vmem:[%s211_s9 + $0x8] sm:$0xff]  ;;  %vm333_vm1 = vcmask 261120   ;;  %s242_s18 = scalar_lea.vmem [#allocation8], %s1050_s10  ;;  %s562_s29 = sshll.u32 %s882_s16, 8 }
  0x7d   : > { %812 = vsyncadd (%p1148_p13), [#allocation6], 4294966784  ;;  %v243_v2 = vld [vmem:[%s202_s11] sm:$0xff]  ;;  %v591_v3 = vpack.c.bf16 %v246_v1, %v245_v0  ;;  %v248_v5 = vld [vmem:[#allocation7 + $0x8] sm:$0xff]  ;;  %s431_s6 = sshll.u32 %s242_s18, 4  ;;  %s1077_s23 = scalar_lea.hbm %s1124_s3, %s562_s29  ;;  %s1072_s6 = int_to_ptr.vmem [resolvable:$true] %s431_s6 }
  0x7e   : > { %577 = vmatprep.mubr.msk.f32.mxu0 %vm251_vm0, %v243_v2  ;;  %v247_v4 = vld [vmem:[#allocation7] sm:$0xff]  ;;  %v249_v7 = vld [vmem:[#allocation7 + $0x10] sm:$0xff]  ;;  %v250_v8 = vld [vmem:[#allocation7 + $0x18] sm:$0xff]  ;;  %s418_s27 = scalar_lea.sflag [#allocation4], %s1047_s2  ;;  %s757_s5 = scalar_lea.vmem %s1072_s6, 256 }
  0x7f   : > { %v595_v6 = vpack.c.bf16 %v248_v5, %v247_v4  ;;  %592 = vmatprep.subr.bf16.mxu0 %v591_v3  ;;  %v599_v9 = vpack.c.bf16 %v250_v8, %v249_v7  ;;  %v244_v10 = vld [vmem:[%s202_s11 + $0x8] sm:$0xff]  ;;  %p758_p3 = scmp.ne.s32.totalorder %s1072_s6, %s757_s5  ;;  %s838_s16 = smov [#allocation8]  }
  0x80   : > { %594 = vmatpush3.bf16.msra.mxu0 %v591_v3  ;;  %s761_s8 = sshll.u32 %s838_s16, 4  ;;  %s762_s8 = int_to_ptr.vmem [resolvable:$false] %s761_s8 }
  0x81   : > { %596 = vmatprep.subr.bf16.mxu1 %v595_v6  ;;  %p759_p7 = pnand %p758_p3, %p955_p12  ;;  %s763_s28 = scalar_lea.vmem %s762_s8, 512 }
  0x82   : > { %598 = vmatpush3.bf16.msra.mxu1 %v595_v6  ;;  %p764_p1 = scmp.lt.s32.totalorder %s1072_s6, %s762_s8  ;;  %p765_p5 = scmp.lt.s32.totalorder %s763_s28, %s757_s5 }
  0x83   : > { %600 = vmatprep.subr.bf16.mxu1 %v599_v9  ;;  %578 = vmatmul.mubr.msk.f32.vlgmr.msra.gmra.mrb[0].mxu0 %vm251_vm0, %v244_v10  ;;  %p760_p9 = pneg %p759_p7 }
  0x84   : > { %p766_p2 = por %p765_p5, %p764_p1 }
  0x86   : > { %602 = vmatpush3.bf16.msra.mxu1 %v599_v9  ;;  %p767_p6 = pnand %p766_p2, %p760_p9 }
 0x156   : > { %v579_v11 = vpop.f32.mrb[0].mxu0 }
 0x157   : > { %v324_v12 = vpop.f32.mrb[1].mxu0 }
 0x158   : > { %588 = vmatprep.mubr.msk.f32.mxu1 %vm333_vm1, %v324_v12 }
 0x159   : > { %589 = vmatmul.mubr.msk.f32.vlgmr.msra.gmra.mrb[0].mxu1 %vm333_vm1, %v579_v11 }
 0x22c   : > { %v590_v13 = vpop.f32.mrb[0].mxu1 }
 0x22d   : > { %416 = vst [vmem:[%s242_s18 + $0x8] sm:$0xff] %v590_v13  ;;  %v406_v14 = vpop.f32.mrb[1].mxu1 }
 0x22e   : > { %415 = vst [vmem:[%s242_s18] sm:$0xff] %v406_v14 }
 0x22f   : > { %770 = shalt.err (!%p767_p6)
}
 0x230   : > { %s771_s22 = scalar_lea.hbm %s1077_s23, 256  ;;  %s775_s10 = scalar_lea.hbm %s1124_s3, 512 }
 0x231   : > { %p772_p8 = scmp.ne.s32.totalorder %s1077_s23, %s771_s22  ;;  %p776_p4 = scmp.lt.u32.totalorder %s1077_s23, %s1124_s3 }
 0x232   : > { %p777_p11 = scmp.lt.u32.totalorder %s775_s10, %s771_s22  ;;  %p779_p3 = scmp.lt.u32.totalorder %s771_s22, %s1077_s23 }
 0x233   : > { %p773_p10 = pnand %p772_p8, %p955_p12 }
 0x234   : > { %p778_p13 = por %p777_p11, %p776_p4 }
 0x235   : > { %p774_p0 = pneg %p773_p10 }
 0x236   : > { %p780_p7 = por %p779_p3, %p778_p13 }
 0x238   : > { %p781_p9 = pnand %p780_p7, %p774_p0 }
 0x23a   : > { %784 = shalt.err (!%p781_p9)
}
 0x23b   : > { %s839_s20 = smov 128   ;;  %s840_s7 = smov 8  }
 0x23c   : > { %611 = dma.vmem_to_hbm [thread:$0]  (%p955_p12), %s1072_s6, 256, %s1077_s23, %s418_s27, %s839_s20, %s839_s20, %s840_s7  }
 0x23d PF: > { %s446_s9 = sand.u32 1, %s819_s12   ;;  %p1149_p1 = scmp.ne.s32.totalorder %s1135_s19, 0 }
 0x23e   : > { %p1150_p5 = scmp.ge.s32.totalorder %s831_s15, 2  ;;  %s447_s18 = scalar_lea.sflag [#allocation4], %s446_s9 }
 0x240   : > { %p625_p2 = pnand %p1150_p5, %p1149_p1 }
 0x242   : > { %814 = dma.done.wait (!%p625_p2), %s447_s18, 256  }
 0x243   : > { %816 = vsyncadd (!%p625_p2), %s447_s18, 4294967040  ;;  %p19_p6 = scmp.ge.s32.totalorder %s917_s24, 4   ;;  %s1151_s12 = smov %s823_s13 }
 0x244   : > { %s1152_s13 = smov %s827_s14  ;;  %s1153_s14 = smov %s951_s17 }
 0x245   : > { %s1154_s15 = smov %s917_s24  ;;  %21 = sbr.rel (!%p19_p6) target bundleno = 10 (0xa), region = 94 }
 0x24c   :  { %452 = vsyncpa [#allocation3], 1 }
 0x24d   :  { %454 = vsyncpa [#allocation3 + $0x1], 1 }
 0x24e   :  { %455 = vsyncpa [#allocation6], 1 }
 0x24f   :  { %457 = vsyncpa [#allocation6 + $0x1], 1 }
 0x250   :  { %458 = vsyncpa [#allocation4], 1 }
 0x251   :  { %460 = vsyncpa [#allocation4 + $0x1], 1 }

</bundles_post_ra>
